<compile_context>
chip_gen: v5e
topology: v5e:2x2
jax: 0.10.0
libtpu: 0.0.40
codegen_flags: <defaults>
</compile_context>

<pallas_src>
import jax
import jax.numpy as jnp
from jax import lax
from jax.experimental import pallas as pl
from jax.experimental.pallas import tpu as pltpu

_LANE = 128
_MIB = 1024 * 1024


def _round_up(x: int, m: int) -> int:
    return -(-x // m) * m


def _vmem_budget_bytes() -> int:
    """Per-generation budget for the double-buffered in+out tile data."""
    try:
        cap = int(pltpu.get_tpu_info().vmem_capacity_bytes)
    except Exception:
        cap = 64 * _MIB  # conservative fallback: v7x per-TC VMEM
    # v5e/v6e (128 MiB physical) -> 48 MiB of tiles; v7x (64 MiB) -> 32 MiB.
    return min(cap // 2, 48 * _MIB)


def _tile_footprint(tb: int, tc: int, tl: int, itemsize: int, sub: int) -> int:
    """Double-buffered VMEM bytes for input (tb,tc,tl) + output (tb,tl,tc)
    blocks, accounting for (sublane, lane) padding of the last two dims."""
    in_bytes = tb * _round_up(tc, sub) * _round_up(tl, _LANE) * itemsize
    out_bytes = tb * _round_up(tl, sub) * _round_up(tc, _LANE) * itemsize
    return 2 * (in_bytes + out_bytes)


def _pick_tiles(B: int, C: int, L: int, itemsize: int, budget: int):
    sub = max(8, 32 // itemsize)  # sublane packing: 8 f32 / 16 bf16 / 32 int8

    # dtype-aware minimum L tile: keep the strided per-channel-row DMA reads
    # at >= 512 contiguous bytes (128 f32 / 256 bf16 / 512 int8).
    min_tl = max(_LANE, 512 // itemsize)
    if min_tl >= L:
        min_tl = L

    # ---- channel tile: keep C whole if its padded tiles fit the budget ----
    if _tile_footprint(1, C, min_tl, itemsize, sub) <= budget:
        TC = C
    else:
        per_tc = 2 * itemsize * (_round_up(min_tl, _LANE) + _round_up(min_tl, sub))
        TC = max(_LANE, (budget // per_tc) // _LANE * _LANE)
        if TC >= C:
            TC = C

    # ---- L tile: as large as the budget allows (multiple of 128, or full L) ----
    per_tl = 2 * itemsize * (_round_up(TC, sub) + _round_up(TC, _LANE))
    TL = max((budget // per_tl) // _LANE * _LANE, min_tl)
    if TL >= L:
        TL = L

    # ---- batch tile: fold batches when C*L is small so each step moves a
    #      healthy payload instead of being dominated by per-step overhead ----
    TB = 1
    if TC == C and TL == L and B > 1:
        per_tb_fp = _tile_footprint(1, C, L, itemsize, sub)
        per_tb_actual = 2 * C * L * itemsize              # real in+out bytes / batch
        tb_budget = max(1, budget // per_tb_fp)
        tb_payload = max(1, (8 * _MIB) // per_tb_actual)  # cap payload ~8 MiB / step
        TB = max(1, min(B, tb_budget, tb_payload))

    return TB, TC, TL, _tile_footprint(TB, TC, TL, itemsize, sub)


def _permute_021_kernel(x_ref, o_ref):
    # x_ref: (TB, TC, TL) ; o_ref: (TB, TL, TC).
    # Transpose each batch slab as a 2-D .T (XLU); .T on the 3-D block would
    # reverse all three axes.
    tb = x_ref.shape[0]

    def body(b, carry):
        o_ref[b] = x_ref[b].T
        return carry

    lax.fori_loop(0, tb, body, 0, unroll=tb <= 8)


def permute(x: jax.Array, dims=(0, 2, 1), *, force_pallas: bool = False,
            vmem_budget_bytes: int | None = None) -> jax.Array:
    """Pallas equivalent of torch.permute(x, dims).

    The (0, 2, 1) swap on 3-D inputs (the LSTM_FCNPlus case) runs as a tiled
    Pallas kernel; other permutations and tiny inputs use jnp.transpose.
    """
    dims = tuple(dims)
    if x.ndim != 3 or dims != (0, 2, 1):
        # TODO(synk): only the LSTM_FCNPlus (0, 2, 1) case has a dedicated
        # Pallas kernel; other permutations use XLA's transpose.
        return jnp.transpose(x, dims)

    B, C, L = x.shape
    itemsize = x.dtype.itemsize
    total_bytes = B * C * L * itemsize

    # Dispatch threshold: tiny tensors / tiny channel counts are better served
    # by XLA's (fusible) transpose than a standalone memory-bound kernel.
    if not force_pallas and (total_bytes < 1 * _MIB or C < 16):
        return jnp.transpose(x, (0, 2, 1))

    budget = int(vmem_budget_bytes) if vmem_budget_bytes is not None else _vmem_budget_bytes()
    TB, TC, TL, footprint = _pick_tiles(B, C, L, itemsize, budget)
    vmem_limit = max(32 * _MIB, footprint + 4 * _MIB)

    grid = (pl.cdiv(B, TB), pl.cdiv(L, TL), pl.cdiv(C, TC))

    return pl.pallas_call(
        _permute_021_kernel,
        out_shape=jax.ShapeDtypeStruct((B, L, C), x.dtype),
        grid=grid,
        in_specs=[pl.BlockSpec((TB, TC, TL), lambda b, l, c: (b, c, l))],
        out_specs=pl.BlockSpec((TB, TL, TC), lambda b, l, c: (b, l, c)),
        compiler_params=pltpu.CompilerParams(
            dimension_semantics=("parallel", "parallel", "parallel"),
            vmem_limit_bytes=vmem_limit,
        ),
        cost_estimate=pl.CostEstimate(
            flops=0, transcendentals=0, bytes_accessed=2 * total_bytes
        ),
    )(x)


class Permute:
    """Drop-in analogue of the PyTorch Permute module."""

    def __init__(self, dims):
        self.dims = tuple(dims)

    def __call__(self, x):
        return permute(x, self.dims)


if __name__ == "__main__":
    key = jax.random.PRNGKey(0)

    # 1) LSTM_FCNPlus-sized input (batch, channels, seq_len); force the Pallas
    #    path (the dispatcher would otherwise hand this tiny tensor to XLA).
    B, C, L = 2, 4, 16
    x = jax.random.normal(key, (B, C, L), dtype=jnp.float32)
    y = jax.block_until_ready(permute(x, (0, 2, 1), force_pallas=True))
    assert y.shape == (B, L, C)
    assert jnp.array_equal(y, jnp.transpose(x, (0, 2, 1)))

    # 2) Shape big enough to take the Pallas path via the normal dispatcher
    #    (whole-C lane-dense blocks, batch folded into the block).
    x2 = jax.random.normal(jax.random.PRNGKey(1), (2, 256, 640), dtype=jnp.float32)
    y2 = jax.block_until_ready(Permute((0, 2, 1))(x2))
    assert y2.shape == (2, 640, 256)
    assert jnp.array_equal(y2, jnp.transpose(x2, (0, 2, 1)))

    # 3) Tiny artificial VMEM budget to exercise the fully tiled path
    #    (C- and L-tiling with partial edge tiles).
    x3 = jax.random.normal(jax.random.PRNGKey(2), (2, 320, 600), dtype=jnp.float32)
    y3 = jax.block_until_ready(
        permute(x3, (0, 2, 1), force_pallas=True, vmem_budget_bytes=256 * 1024)
    )
    assert y3.shape == (2, 600, 320)
    assert jnp.array_equal(y3, jnp.transpose(x3, (0, 2, 1)))

    # 4) Dispatcher fallback for tiny inputs (same torch.permute semantics).
    y4 = jax.block_until_ready(permute(x, (0, 2, 1)))
    assert jnp.array_equal(y4, jnp.transpose(x, (0, 2, 1)))

    print("KERNEL_OK")
</pallas_src>

<mosaic_0001>
module attributes {stable_mosaic.version = 11 : i64} {
  func.func @_permute_021_kernel(%arg0: i32, %arg1: i32, %arg2: i32, %arg3: memref<2x4x16xf32, #tpu.memory_space<vmem>>, %arg4: memref<2x16x4xf32, #tpu.memory_space<vmem>>) attributes {dimension_semantics = [#tpu.dimension_semantics<parallel>, #tpu.dimension_semantics<parallel>, #tpu.dimension_semantics<parallel>], iteration_bounds = array<i64: 1, 1, 1>, scalar_prefetch = 0 : i64, scratch_operands = 0 : i64, tpu.core_type = #tpu.core_type<tc>, window_params = [{transform_indices = @transform_0, window_bounds = array<i64: 2, 4, 16>}, {transform_indices = @transform_1, window_bounds = array<i64: 2, 16, 4>}]} {
    %c0_i32 = arith.constant 0 : i32
    %0 = arith.index_cast %c0_i32 : i32 to index
    %c0 = arith.constant 0 : index
    %c0_0 = arith.constant 0 : index
    %1 = vector.load %arg3[%0, %c0, %c0_0] : memref<2x4x16xf32, #tpu.memory_space<vmem>>, vector<1x4x16xf32>
    %2 = vector.shape_cast %1 : vector<1x4x16xf32> to vector<4x16xf32>
    %3 = tpu.transpose %2, [1, 0] : vector<4x16xf32> -> vector<16x4xf32>
    %4 = arith.index_cast %c0_i32 : i32 to index
    %c0_1 = arith.constant 0 : index
    %c0_2 = arith.constant 0 : index
    %5 = vector.load %arg4[%4, %c0_1, %c0_2] : memref<2x16x4xf32, #tpu.memory_space<vmem>>, vector<1x16x4xf32>
    %6 = vector.shape_cast %5 : vector<1x16x4xf32> to vector<16x4xf32>
    %7 = vector.shape_cast %3 : vector<16x4xf32> to vector<1x16x4xf32>
    tpu.vector_store %arg4[%4, %c0_1, %c0_2], %7 {strides = array<i32>} : memref<2x16x4xf32, #tpu.memory_space<vmem>>, vector<1x16x4xf32>,
    %c1_i32 = arith.constant 1 : i32
    %8 = arith.index_cast %c1_i32 : i32 to index
    %c0_3 = arith.constant 0 : index
    %c0_4 = arith.constant 0 : index
    %9 = vector.load %arg3[%8, %c0_3, %c0_4] : memref<2x4x16xf32, #tpu.memory_space<vmem>>, vector<1x4x16xf32>
    %10 = vector.shape_cast %9 : vector<1x4x16xf32> to vector<4x16xf32>
    %11 = tpu.transpose %10, [1, 0] : vector<4x16xf32> -> vector<16x4xf32>
    %12 = arith.index_cast %c1_i32 : i32 to index
    %c0_5 = arith.constant 0 : index
    %c0_6 = arith.constant 0 : index
    %13 = vector.load %arg4[%12, %c0_5, %c0_6] : memref<2x16x4xf32, #tpu.memory_space<vmem>>, vector<1x16x4xf32>
    %14 = vector.shape_cast %13 : vector<1x16x4xf32> to vector<16x4xf32>
    %15 = vector.shape_cast %11 : vector<16x4xf32> to vector<1x16x4xf32>
    tpu.vector_store %arg4[%12, %c0_5, %c0_6], %15 {strides = array<i32>} : memref<2x16x4xf32, #tpu.memory_space<vmem>>, vector<1x16x4xf32>,
    %c2_i32 = arith.constant 2 : i32
    return
  }
  func.func @transform_0(%arg0: i32, %arg1: i32, %arg2: i32) -> (i32, i32, i32) {
    %c0_i32 = arith.constant 0 : i32
    return %arg0, %arg2, %arg1 : i32, i32, i32
  }
  func.func @transform_1(%arg0: i32, %arg1: i32, %arg2: i32) -> (i32, i32, i32) {
    %c0_i32 = arith.constant 0 : i32
    return %arg0, %arg1, %arg2 : i32, i32, i32
  }
}

</mosaic_0001>

<bundles_post_ra>
// kernel: tpu_custom_call.1
= control target key start
LH: loop header
LB: loop body
LE: loop exit
PB: predicated region body
PF: predicated region fallthrough
CT: control target
= control target key end

     0   :  { %6 = vsyncpa [#allocation3], 0  ;;  %s134_s9 = smov [#allocation2]   ;;  %s135_s11 = smov 64   ;;  %s162_s0 = inlined_call_operand.hbm [shape: f32[2,4,16], index: 0, kind: input, shape index: {}]   ;;  %s163_s1 = inlined_call_operand.vmem [shape: f32[2,16,4], index: 1, kind: output, shape index: {}]  }
   0x1   :  { %s11_s8 = sshll.u32 %s162_s0, 4  ;;  %s13_s10 = sshll.u32 %s134_s9, 4  ;;  %s12_s8 = int_to_ptr.hbm [resolvable:$true] %s11_s8  ;;  %s14_s10 = int_to_ptr.vmem [resolvable:$true] %s13_s10 }
   0x2   :  { %s136_s12 = smov 4  }
   0x3   :  { %19 = dma.hbm_to_vmem [thread:$0]  %s12_s8, 128, %s14_s10, [#allocation3], %s135_s11, %s135_s11, %s136_s12  }
   0x4   :  { %132 = dma.done.wait [#allocation3], 128  }
   0x5   :  { %133 = vsyncadd [#allocation3], 4294967168  ;;  %v24_v0 = vld [vmem:[#allocation2] sm:$0xf]  ;;  %v61_v1 = vld [vmem:[#allocation2 + $0x4] sm:$0xf] }
   0x6   :  { %25 = vxpose.xlu0.b32.start.end [1/1] (short) (narrow) %v24_v0, 16  ;;  %vm57_vm0 = vcmask 31744  }
  0x16   :  { %62 = vxpose.xlu0.b32.start.end [1/1] (short) (narrow) %v61_v1, 16 }
  0xaa   :  { %v41_v2 = vpop.trf.xlu0 }
  0xab   :  { %58 = vst.msk [vmem:[%s163_s1] sm:$0xff] %vm57_vm0, %v41_v2 }
  0xb2   :  { %v42_v3 = vpop.trf.xlu0 }
  0xb3   :  { %59 = vst.msk [vmem:[%s163_s1 + $0x8] sm:$0xff] %vm57_vm0, %v42_v3 }
  0xba   :  { %v78_v4 = vpop.trf.xlu0 }
  0xbb   :  { %102 = vst.msk [vmem:[%s163_s1 + $0x10] sm:$0xff] %vm57_vm0, %v78_v4 }
  0xc2   :  { %v79_v5 = vpop.trf.xlu0 }
  0xc3   :  { %103 = vst.msk [vmem:[%s163_s1 + $0x18] sm:$0xff] %vm57_vm0, %v79_v5 }
  0xc4   :  { %101 = vsyncpa [#allocation3], 1 }

</bundles_post_ra>
